<compile_context>
chip_gen: v5e
topology: v5e:2x2
jax: 0.10.0
libtpu: 0.0.40
codegen_flags: <defaults>
</compile_context>

<pallas_src>
import jax
import jax.numpy as jnp
from jax.experimental import pallas as pl
from jax.experimental.pallas import tpu as pltpu

_LANE = 128
_SUBLANE = 8


def _detect_num_tensorcores() -> int:
    """Best effort: v7x exposes 2 TensorCores per chip; v5e/v6e expose 1."""
    try:
        kind = jax.devices()[0].device_kind.lower()
    except Exception:
        return 1
    return 2 if "v7" in kind else 1


def _choose_tile_d(D: int, num_tc: int, requested, cap: int = 4096) -> int:
    if requested is not None:
        assert D % requested == 0, "tile_d must divide D"
        assert requested == D or requested % _LANE == 0, \
            "tile_d must be lane-aligned (128) or equal to D"
        return requested
    if D % _LANE != 0:
        return D                      # full-dim block is always layout-legal
    upper = D
    if num_tc >= 2 and D >= 2 * _LANE:
        upper = D // num_tc           # >= num_tc tiles so both TCs stream (v7x)
    upper = min(upper, cap)           # bound per-block VMEM for very large D
    if upper >= D:
        return D                      # single-TC: full-width contiguous blocks
    start = max(_LANE, (upper // _LANE) * _LANE)
    for td in range(start, _LANE - 1, -_LANE):
        if D % td == 0:
            return td
    return D


def _choose_tile_n(N: int, tile_d: int, itemsize: int, target_bytes: int,
                   requested) -> int:
    budget_rows = max(_LANE, target_bytes // max(1, tile_d * itemsize))
    want = min(requested if requested is not None else budget_rows, N)
    # Full-extent block along N when it is short or fits the budget with an
    # 8-aligned contraction dim (always layout-legal: block dim == array dim).
    if N < _LANE or (want == N and N % _SUBLANE == 0):
        return N
    # Otherwise tile with a 128-multiple (mask lane dim / seq sublane dim both
    # aligned) that never exceeds N, so every window starts inside the array.
    tn = max(_LANE, (want // _LANE) * _LANE)
    return min(tn, (N // _LANE) * _LANE)


def _dot_row(row_f32, x):
    """(1, tn) @ (tn, td) on the MXU with f32 accumulation."""
    if x.dtype == jnp.float32:
        lhs, rhs = row_f32, x
    elif jnp.issubdtype(x.dtype, jnp.floating):
        # bf16 / f16 seq: keep the native MXU path (binary masks are exact).
        lhs, rhs = row_f32.astype(x.dtype), x
    else:
        lhs, rhs = row_f32, x.astype(jnp.float32)
    return jnp.dot(lhs, rhs, preferred_element_type=jnp.float32)


def _make_masked_sum_kernel(rem: int, tile_n: int):
    def kernel(seq_ref, msk_ref, out_ref):
        n = pl.program_id(1)

        @pl.when(n == 0)
        def _init():
            out_ref[...] = jnp.zeros_like(out_ref)

        x = seq_ref[...]                          # (tile_n, tile_d)
        row = msk_ref[...].astype(jnp.float32)    # (1, tile_n), lane-dense

        if rem:  # static: only emitted when N % tile_n != 0
            not_last = n != pl.num_programs(1) - 1
            lane_ids = jax.lax.broadcasted_iota(jnp.int32, row.shape, 1)
            row = jnp.where(jnp.logical_or(not_last, lane_ids < rem), row, 0.0)
            row_ids = jax.lax.broadcasted_iota(jnp.int32, x.shape, 0)
            x = jnp.where(jnp.logical_or(not_last, row_ids < rem), x, 0)

        out_ref[...] += _dot_row(row, x)
    return kernel


def _make_plain_sum_kernel(rem: int, tile_n: int):
    def kernel(seq_ref, out_ref):
        n = pl.program_id(1)

        @pl.when(n == 0)
        def _init():
            out_ref[...] = jnp.zeros_like(out_ref)

        x = seq_ref[...]                          # (tile_n, tile_d)

        if rem:  # static: ragged tail handling
            not_last = n != pl.program_id(1) * 0 + pl.num_programs(1) - 1 \
                if False else (n != pl.num_programs(1) - 1)
            lane_ids = jax.lax.broadcasted_iota(jnp.int32, (1, tile_n), 1)
            row = jnp.where(jnp.logical_or(not_last, lane_ids < rem), 1.0, 0.0)
            row_ids = jax.lax.broadcasted_iota(jnp.int32, x.shape, 0)
            x = jnp.where(jnp.logical_or(not_last, row_ids < rem), x, 0)
        else:
            row = jnp.ones((1, tile_n), jnp.float32)

        out_ref[...] += _dot_row(row, x)
    return kernel


def avg_readout(seq, msk=None, *, tile_n=None, tile_d=None,
                target_block_bytes=None):
    """Pallas equivalent of AvgReadout.forward.

    seq: (N, D) array.
    msk: optional (N,) array, broadcast over D (torch.unsqueeze(msk, -1)).
    returns: (D,) array in seq.dtype (f32 internally).
    NOTE: like PyTorch, an all-zero mask yields NaN/Inf (division by zero).
    """
    N, D = seq.shape
    num_tc = _detect_num_tensorcores()
    if target_block_bytes is None:
        # Bigger blocks on v7x: at 3.2 TB/s a 4 MiB block is only ~1.2 us of
        # DMA vs ~0.35 us fixed per-step overhead.
        target_block_bytes = (8 if num_tc >= 2 else 4) * 1024 * 1024
    itemsize = jnp.dtype(seq.dtype).itemsize

    tile_d = _choose_tile_d(D, num_tc, tile_d)
    tile_n = _choose_tile_n(N, tile_d, itemsize, target_block_bytes, tile_n)
    grid_n = pl.cdiv(N, tile_n)
    rem = N % tile_n                       # 0 when tile_n divides N (incl. tile_n == N)
    grid = (D // tile_d, grid_n)

    compiler_params = pltpu.CompilerParams(
        dimension_semantics=("parallel", "arbitrary"),
        vmem_limit_bytes=32 * 1024 * 1024,
    )
    out_shape = jax.ShapeDtypeStruct((1, D), jnp.float32)
    out_spec = pl.BlockSpec((1, tile_d), lambda d, n: (0, d))
    seq_spec = pl.BlockSpec((tile_n, tile_d), lambda d, n: (n, d))

    if msk is None:
        summed = pl.pallas_call(
            _make_plain_sum_kernel(rem, tile_n),
            out_shape=out_shape,
            grid_spec=pltpu.PrefetchScalarGridSpec(
                num_scalar_prefetch=0, grid=grid,
                in_specs=[seq_spec], out_specs=out_spec),
            compiler_params=compiler_params,
        )(seq)
        denom = jnp.float32(N)
    else:
        # Lane-dense (1, N) layout: one contiguous DMA per tile, feeds the
        # MXU dot directly (no (tile_n, 1) -> 128-lane padding).
        msk_row = msk.astype(jnp.float32).reshape(1, N)
        msk_spec = pl.BlockSpec((1, tile_n), lambda d, n: (0, n))
        summed = pl.pallas_call(
            _make_masked_sum_kernel(rem, tile_n),
            out_shape=out_shape,
            grid_spec=pltpu.PrefetchScalarGridSpec(
                num_scalar_prefetch=0, grid=grid,
                in_specs=[seq_spec, msk_spec], out_specs=out_spec),
            compiler_params=compiler_params,
        )(seq, msk_row)
        # Denominator is a single scalar: hoisted out of the hot loop.
        denom = jnp.sum(msk.astype(jnp.float32))

    out = summed.reshape(D) / denom
    if jnp.issubdtype(seq.dtype, jnp.floating):
        out = out.astype(seq.dtype)
    return out


if __name__ == "__main__":
    key = jax.random.PRNGKey(0)
    k1, k2, k3, k4 = jax.random.split(key, 4)

    # Small shapes consistent with the module (N nodes, D hidden features).
    N, D = 16, 32
    seq = jax.random.normal(k1, (N, D), dtype=jnp.float32)
    msk = (jax.random.uniform(k2, (N,)) > 0.5).astype(jnp.float32)

    out_mean = avg_readout(seq, None)
    jax.block_until_ready(out_mean)
    ref_mean = jnp.mean(seq, axis=0)
    assert jnp.allclose(out_mean, ref_mean, atol=1e-5), "unmasked mismatch (small)"

    out_masked = avg_readout(seq, msk)
    jax.block_until_ready(out_masked)
    ref_masked = jnp.sum(seq * msk[:, None], axis=0) / jnp.sum(msk)
    assert jnp.allclose(out_masked, ref_masked, atol=1e-5), "masked mismatch (small)"

    # Ragged N + multi-tile grid: exercises pad-free tail masking, D tiling,
    # cross-step accumulation into the resident output block.
    N2, D2 = 1037, 256
    seq2 = jax.random.normal(k3, (N2, D2), dtype=jnp.float32)
    msk2 = (jax.random.uniform(k4, (N2,)) > 0.3).astype(jnp.float32)

    out2 = avg_readout(seq2, msk2, tile_n=256, tile_d=128)
    jax.block_until_ready(out2)
    ref2 = jnp.sum(seq2 * msk2[:, None], axis=0) / jnp.sum(msk2)
    assert jnp.allclose(out2, ref2, atol=1e-4), "masked mismatch (tiled)"

    out3 = avg_readout(seq2, None)          # auto tiling: full-width D, ragged tail
    jax.block_until_ready(out3)
    ref3 = jnp.mean(seq2, axis=0)
    assert jnp.allclose(out3, ref3, atol=1e-4), "unmasked mismatch (auto-tiled)"

    out4 = avg_readout(seq2, msk2)          # auto tiling, masked
    jax.block_until_ready(out4)
    assert jnp.allclose(out4, ref2, atol=1e-4), "masked mismatch (auto-tiled)"

    print("KERNEL_OK")
</pallas_src>

<mosaic_0001>
module attributes {stable_mosaic.version = 11 : i64} {
  func.func @kernel(%arg0: i32, %arg1: i32, %arg2: memref<16x32xf32, #tpu.memory_space<vmem>>, %arg3: memref<1x32xf32, #tpu.memory_space<vmem>>) attributes {dimension_semantics = [#tpu.dimension_semantics<parallel>, #tpu.dimension_semantics<arbitrary>], iteration_bounds = array<i64: 1, 1>, scalar_prefetch = 0 : i64, scratch_operands = 0 : i64, tpu.core_type = #tpu.core_type<tc>, window_params = [{transform_indices = @transform_0, window_bounds = array<i64: 16, 32>}, {transform_indices = @transform_1, window_bounds = array<i64: 1, 32>}]} {
    %c0_i32 = arith.constant 0 : i32
    %0 = arith.cmpi eq, %arg1, %c0_i32 : i32
    %1 = arith.extui %0 : i1 to i32
    %c0_i32_0 = arith.constant 0 : i32
    %2 = arith.cmpi ne, %1, %c0_i32_0 : i32
    scf.if %2 {
      %cst_7 = arith.constant 0.000000e+00 : f32
      %9 = vector.broadcast %cst_7 : f32 to vector<1x32xf32>
      %c0_8 = arith.constant 0 : index
      %c0_9 = arith.constant 0 : index
      %10 = vector.load %arg3[%c0_8, %c0_9] : memref<1x32xf32, #tpu.memory_space<vmem>>, vector<1x32xf32>
      tpu.vector_store %arg3[%c0_8, %c0_9], %9 {strides = array<i32>} : memref<1x32xf32, #tpu.memory_space<vmem>>, vector<1x32xf32>,
    } else {
    }
    %c0 = arith.constant 0 : index
    %c0_1 = arith.constant 0 : index
    %3 = vector.load %arg2[%c0, %c0_1] : memref<16x32xf32, #tpu.memory_space<vmem>>, vector<16x32xf32>
    %cst = arith.constant 1.000000e+00 : f32
    %4 = vector.broadcast %cst : f32 to vector<1x16xf32>
    %c0_2 = arith.constant 0 : index
    %c0_3 = arith.constant 0 : index
    %5 = vector.load %arg3[%c0_2, %c0_3] : memref<1x32xf32, #tpu.memory_space<vmem>>, vector<1x32xf32>
    %cst_4 = arith.constant dense<0.000000e+00> : vector<1x32xf32>
    %6 = tpu.matmul %4, %3, %cst_4 {dimension_numbers = #tpu.dot_dimension_numbers<[1], [0], [0], [1], [0, 0, 1, 1], [], []>} : vector<1x16xf32>, vector<16x32xf32>, vector<1x32xf32> -> vector<1x32xf32>
    %7 = arith.addf %5, %6 : vector<1x32xf32>
    %c0_5 = arith.constant 0 : index
    %c0_6 = arith.constant 0 : index
    %8 = vector.load %arg3[%c0_5, %c0_6] : memref<1x32xf32, #tpu.memory_space<vmem>>, vector<1x32xf32>
    tpu.vector_store %arg3[%c0_5, %c0_6], %7 {strides = array<i32>} : memref<1x32xf32, #tpu.memory_space<vmem>>, vector<1x32xf32>,
    return
  }
  func.func @transform_0(%arg0: i32, %arg1: i32) -> (i32, i32) {
    %c0_i32 = arith.constant 0 : i32
    return %arg1, %arg0 : i32, i32
  }
  func.func @transform_1(%arg0: i32, %arg1: i32) -> (i32, i32) {
    %c0_i32 = arith.constant 0 : i32
    %c0_i32_0 = arith.constant 0 : i32
    return %c0_i32, %arg0 : i32, i32
  }
}

</mosaic_0001>

<bundles_post_ra>
// kernel: tpu_custom_call.1
= control target key start
LH: loop header
LB: loop body
LE: loop exit
PB: predicated region body
PF: predicated region fallthrough
CT: control target
= control target key end

     0   :  { %6 = vsyncpa [#allocation3], 0  ;;  %s161_s0 = inlined_call_operand.hbm [shape: f32[16,32], index: 0, kind: input, shape index: {}]   ;;  %s162_s1 = inlined_call_operand.hbm [shape: f32[1,32], index: 1, kind: output, shape index: {}]  }
   0x1   :  { %7 = vsyncpa [#allocation4], 0  ;;  %s12_s8 = sshll.u32 %s161_s0, 4  ;;  %s137_s9 = smov [#allocation2]   ;;  %s13_s8 = int_to_ptr.hbm [resolvable:$true] %s12_s8 }
   0x2   :  { %s14_s10 = sshll.u32 %s137_s9, 4  ;;  %s138_s11 = smov 128   ;;  %s15_s10 = int_to_ptr.vmem [resolvable:$true] %s14_s10 }
   0x3   :  { %s139_s12 = smov 8  }
   0x4   :  { %20 = dma.hbm_to_vmem [thread:$0]  %s13_s8, 256, %s15_s10, [#allocation3], %s138_s11, %s138_s11, %s139_s12  }
   0x5   :  { %133 = dma.done.wait [#allocation3], 256  }
   0x6   :  { %134 = vsyncadd [#allocation3], 4294967040  ;;  %vm29_vm0 = vcmask 253952   ;;  %v140_v0 = vmov 0.0   ;;  %v32_v1 = vld [vmem:[#allocation2 + $0x8] sm:$0xff]  ;;  %v31_v2 = vld [vmem:[#allocation2] sm:$0xff] }
   0x7   :  { %30 = vst.msk [vmem:[#allocation5] sm:$0x1] %vm29_vm0, %v140_v0  ;;  %52 = vmatpush.msra.mxu0 %v32_v1  ;;  %vm34_vm1 = vcmask 130048   ;;  %v141_v3 = vmov 1.0   ;;  %s142_s0 = smov [#allocation5]   ;;  %s68_s16 = sshll.u32 %s162_s1, 4  ;;  %s69_s16 = int_to_ptr.hbm [resolvable:$true] %s68_s16 }
   0x8   :  { %s66_s13 = sshll.u32 %s142_s0, 4  ;;  %s67_s13 = int_to_ptr.vmem [resolvable:$true] %s66_s13 }
   0x9   :  { %53 = vmatpush.msra.mxu0 %v31_v2 }
   0xa   :  { %78 = vmatmul.msk.f32.vlgmr.msra.gmra.mxu0 %vm34_vm1, %v141_v3 }
   0xe   :  { %v33_v4 = vld [vmem:[#allocation5] sm:$0x1] }
  0x87   :  { %v55_v5 = vpop.f32.mrf.mxu0 }
  0x88   :  { %v58_v6 = vadd.f32 %v55_v5, %v33_v4 }
  0x8a   :  { %60 = vst.msk [vmem:[#allocation5] sm:$0x1] %vm29_vm0, %v58_v6 }
  0x8b   :  { %71 = dma.vmem_to_hbm [thread:$0]  %s67_s13, 16, %s69_s16, [#allocation4]  }
  0x8c   :  { %135 = dma.done.wait [#allocation4], 16  }
  0x8d   :  { %136 = vsyncadd [#allocation4], 4294967280 }
  0x8e   :  { %76 = vsyncpa [#allocation3], 1 }
  0x8f   :  { %77 = vsyncpa [#allocation4], 1 }

</bundles_post_ra>
